<compile_context>
chip_gen: v5e
topology: v5e:2x2
jax: 0.10.0
libtpu: 0.0.40
codegen_flags: <defaults>
</compile_context>

<pallas_src>
import functools

import jax
import jax.numpy as jnp
from jax import lax
from jax.experimental import pallas as pl
from jax.experimental.pallas import tpu as pltpu


# ------------------------------ Pallas kernel -------------------------------

def _conv_bn_relu_kernel(x_ref, w_ref, scale_ref, shift_ref, out_ref):
    """One (batch row, time tile): K accumulated dots + f32 affine + ReLU.

    x_ref:     (K, 1, C_in, TILE_T)  bf16   shifted input taps
    w_ref:     (K, C_out, C_in)      bf16   conv weights (VMEM resident)
    scale_ref: (C_out, 1)            f32    gamma / sqrt(var + eps)
    shift_ref: (C_out, 1)            f32    (bias - mean) * scale + beta
    out_ref:   (1, C_out, TILE_T)    bf16   channels-first output tile
    """
    k_taps = w_ref.shape[0]
    acc = jnp.dot(w_ref[0], x_ref[0, 0], preferred_element_type=jnp.float32)
    for k in range(1, k_taps):                      # static, tiny (K=3)
        acc = acc + jnp.dot(w_ref[k], x_ref[k, 0],
                            preferred_element_type=jnp.float32)
    y = acc * scale_ref[...] + shift_ref[...]       # f32 epilogue (v5e: no bf16 VPU)
    out_ref[0] = jnp.maximum(y, 0.0).astype(out_ref.dtype)


# ---------------------------- parameter preparation --------------------------

def prepare_conv_block_params(conv_w, conv_b, gamma, beta, running_mean,
                              running_var, *, eps=1e-5,
                              weight_dtype=jnp.bfloat16):
    """Rearrange conv weight for the kernel and fold eval-mode BN into scale/shift.

    Returns (w_koc, scale, shift):
      w_koc: (K, C_out, C_in) weight_dtype   (bf16 matmul operand)
      scale: (C_out, 1) f32                  applied in the f32 epilogue
      shift: (C_out, 1) f32                  conv bias + BN shift folded
    """
    w_koc = jnp.transpose(conv_w, (2, 0, 1)).astype(weight_dtype)
    scale = (gamma / jnp.sqrt(running_var + eps)).astype(jnp.float32)
    shift = ((conv_b - running_mean) * scale + beta).astype(jnp.float32)
    return w_koc, scale[:, None], shift[:, None]


# ------------------------------ forward wrapper ------------------------------

def conv_block_forward(x_bct, w_koc, scale, shift, *, padding=1, tile_t=1024,
                       out_dtype=jnp.bfloat16):
    """ConvBlock forward.  x_bct: (B, C_in, T) -> (B, C_out, T_out) channels-first."""
    B, c_in, T = x_bct.shape
    K, c_out, c_in_w = w_koc.shape
    assert c_in_w == c_in, (c_in_w, c_in)
    # TODO(synk): stride != 1 not implemented (module default stride=1).
    t_out = T + 2 * padding - K + 1

    # Glue (layout only, no FLOPs, input-sized): pad along time, take K shifted
    # channels-first views, cast to the matmul dtype.  No transpose, no im2col.
    x_dtype = w_koc.dtype
    xp = jnp.pad(x_bct, ((0, 0), (0, 0), (padding, padding))).astype(x_dtype)
    x_taps = jnp.stack([xp[:, :, k:k + t_out] for k in range(K)], axis=0)

    # Time-tile: full T_out when short, otherwise a multiple of 128 (lane-dense
    # stores, aligned slices).  At 1024 the double-buffered blocks are well under
    # the 32 MiB scoped-VMEM default on every generation (incl. v7x's 64 MiB chip).
    if t_out <= tile_t:
        tile = t_out
    else:
        tile = max(128, (tile_t // 128) * 128)
    grid_t = pl.cdiv(t_out, tile)

    out_itemsize = jax.dtypes.canonicalize_dtype(out_dtype).itemsize
    cost = pl.CostEstimate(
        flops=2 * B * t_out * K * c_in * c_out,
        transcendentals=0,
        bytes_accessed=(x_taps.size * x_taps.dtype.itemsize
                        + w_koc.size * w_koc.dtype.itemsize
                        + (scale.size + shift.size) * 4
                        + B * c_out * t_out * out_itemsize),
    )

    return pl.pallas_call(
        _conv_bn_relu_kernel,
        grid=(B, grid_t),
        in_specs=[
            pl.BlockSpec((K, 1, c_in, tile), lambda b, t: (0, b, 0, t)),
            pl.BlockSpec((K, c_out, c_in), lambda b, t: (0, 0, 0)),   # VMEM-resident
            pl.BlockSpec((c_out, 1), lambda b, t: (0, 0)),            # VMEM-resident
            pl.BlockSpec((c_out, 1), lambda b, t: (0, 0)),            # VMEM-resident
        ],
        out_specs=pl.BlockSpec((1, c_out, tile), lambda b, t: (b, 0, t)),
        out_shape=jax.ShapeDtypeStruct((B, c_out, t_out), out_dtype),
        compiler_params=pltpu.CompilerParams(
            dimension_semantics=("parallel", "parallel")),            # 2 TCs on v7x
        cost_estimate=cost,
    )(x_taps, w_koc, scale, shift)


# ------------------------------ pure-JAX reference ---------------------------

def conv_block_reference(x_bct, conv_w, conv_b, gamma, beta, mean, var, eps=1e-5):
    """f32 reference: Conv1d(k=3, p=1, s=1) + BatchNorm1d(eval) + ReLU."""
    y = lax.conv_general_dilated(
        x_bct, conv_w, window_strides=(1,), padding=((1, 1),),
        dimension_numbers=("NCH", "OIH", "NCH"))
    y = y + conv_b[None, :, None]
    y = (y - mean[None, :, None]) * (gamma / jnp.sqrt(var + eps))[None, :, None]
    y = y + beta[None, :, None]
    return jnp.maximum(y, 0.0)


# ------------------------------ main -----------------------------------------

if __name__ == "__main__":
    B, C_IN, T = 2, 4, 16
    C_OUT, K, PAD = 128, 3, 1

    key = jax.random.PRNGKey(0)
    kx, kw, kb, kg, kbe, km, kv = jax.random.split(key, 7)
    x = jax.random.normal(kx, (B, C_IN, T), jnp.float32)
    conv_w = 0.1 * jax.random.normal(kw, (C_OUT, C_IN, K), jnp.float32)
    conv_b = 0.1 * jax.random.normal(kb, (C_OUT,), jnp.float32)
    gamma = 1.0 + 0.1 * jax.random.normal(kg, (C_OUT,), jnp.float32)
    beta = 0.1 * jax.random.normal(kbe, (C_OUT,), jnp.float32)
    r_mean = 0.1 * jax.random.normal(km, (C_OUT,), jnp.float32)
    r_var = 1.0 + jnp.abs(0.1 * jax.random.normal(kv, (C_OUT,), jnp.float32))

    # TODO(synk): training-mode BatchNorm (batch statistics + running-stat updates)
    # is not implemented; eval-mode running stats are folded into scale/shift.
    w_koc, scale, shift = prepare_conv_block_params(
        conv_w, conv_b, gamma, beta, r_mean, r_var)

    fwd = jax.jit(functools.partial(conv_block_forward, padding=PAD))
    y = fwd(x, w_koc, scale, shift)
    jax.block_until_ready(y)
    assert y.shape == (B, C_OUT, T), y.shape
    assert y.dtype == jnp.bfloat16, y.dtype

    y_ref = conv_block_reference(x, conv_w, conv_b, gamma, beta, r_mean, r_var)
    err = float(jnp.max(jnp.abs(y.astype(jnp.float32) - y_ref)))
    # bf16 matmul operands + bf16 output store; scale/shift applied in f32.
    assert err < 3e-2, f"max abs err {err}"
    print("KERNEL_OK")
</pallas_src>

<mosaic_0001>
module attributes {stable_mosaic.version = 11 : i64} {
  func.func @_conv_bn_relu_kernel(%arg0: i32, %arg1: i32, %arg2: memref<3x1x4x16xbf16, #tpu.memory_space<vmem>>, %arg3: memref<3x128x4xbf16, #tpu.memory_space<vmem>>, %arg4: memref<128x1xf32, #tpu.memory_space<vmem>>, %arg5: memref<128x1xf32, #tpu.memory_space<vmem>>, %arg6: memref<1x128x16xbf16, #tpu.memory_space<vmem>>) attributes {dimension_semantics = [#tpu.dimension_semantics<parallel>, #tpu.dimension_semantics<parallel>], iteration_bounds = array<i64: 2, 1>, scalar_prefetch = 0 : i64, scratch_operands = 0 : i64, tpu.core_type = #tpu.core_type<tc>, window_params = [{transform_indices = @transform_0, window_bounds = array<i64: 3, 1, 4, 16>}, {pipeline_mode = #tpu.pipeline_mode<synchronous>, transform_indices = @transform_1, window_bounds = array<i64: 3, 128, 4>}, {pipeline_mode = #tpu.pipeline_mode<synchronous>, transform_indices = @transform_2, window_bounds = array<i64: 128, 1>}, {pipeline_mode = #tpu.pipeline_mode<synchronous>, transform_indices = @transform_3, window_bounds = array<i64: 128, 1>}, {transform_indices = @transform_4, window_bounds = array<i64: 1, 128, 16>}]} {
    %c0 = arith.constant 0 : index
    %c0_0 = arith.constant 0 : index
    %c0_1 = arith.constant 0 : index
    %0 = vector.load %arg3[%c0, %c0_0, %c0_1] : memref<3x128x4xbf16, #tpu.memory_space<vmem>>, vector<1x128x4xbf16>
    %1 = vector.shape_cast %0 : vector<1x128x4xbf16> to vector<128x4xbf16>
    %c0_2 = arith.constant 0 : index
    %c0_3 = arith.constant 0 : index
    %c0_4 = arith.constant 0 : index
    %c0_5 = arith.constant 0 : index
    %2 = vector.load %arg2[%c0_2, %c0_3, %c0_4, %c0_5] : memref<3x1x4x16xbf16, #tpu.memory_space<vmem>>, vector<1x1x4x16xbf16>
    %3 = vector.shape_cast %2 : vector<1x1x4x16xbf16> to vector<4x16xbf16>
    %cst = arith.constant dense<0.000000e+00> : vector<128x16xf32>
    %4 = tpu.matmul %1, %3, %cst {dimension_numbers = #tpu.dot_dimension_numbers<[1], [0], [0], [1], [0, 0, 1, 1], [], []>} : vector<128x4xbf16>, vector<4x16xbf16>, vector<128x16xf32> -> vector<128x16xf32>
    %c1 = arith.constant 1 : index
    %c0_6 = arith.constant 0 : index
    %c0_7 = arith.constant 0 : index
    %5 = vector.load %arg3[%c1, %c0_6, %c0_7] : memref<3x128x4xbf16, #tpu.memory_space<vmem>>, vector<1x128x4xbf16>
    %6 = vector.shape_cast %5 : vector<1x128x4xbf16> to vector<128x4xbf16>
    %c1_8 = arith.constant 1 : index
    %c0_9 = arith.constant 0 : index
    %c0_10 = arith.constant 0 : index
    %c0_11 = arith.constant 0 : index
    %7 = vector.load %arg2[%c1_8, %c0_9, %c0_10, %c0_11] : memref<3x1x4x16xbf16, #tpu.memory_space<vmem>>, vector<1x1x4x16xbf16>
    %8 = vector.shape_cast %7 : vector<1x1x4x16xbf16> to vector<4x16xbf16>
    %cst_12 = arith.constant dense<0.000000e+00> : vector<128x16xf32>
    %9 = tpu.matmul %6, %8, %cst_12 {dimension_numbers = #tpu.dot_dimension_numbers<[1], [0], [0], [1], [0, 0, 1, 1], [], []>} : vector<128x4xbf16>, vector<4x16xbf16>, vector<128x16xf32> -> vector<128x16xf32>
    %10 = arith.addf %4, %9 : vector<128x16xf32>
    %c2 = arith.constant 2 : index
    %c0_13 = arith.constant 0 : index
    %c0_14 = arith.constant 0 : index
    %11 = vector.load %arg3[%c2, %c0_13, %c0_14] : memref<3x128x4xbf16, #tpu.memory_space<vmem>>, vector<1x128x4xbf16>
    %12 = vector.shape_cast %11 : vector<1x128x4xbf16> to vector<128x4xbf16>
    %c2_15 = arith.constant 2 : index
    %c0_16 = arith.constant 0 : index
    %c0_17 = arith.constant 0 : index
    %c0_18 = arith.constant 0 : index
    %13 = vector.load %arg2[%c2_15, %c0_16, %c0_17, %c0_18] : memref<3x1x4x16xbf16, #tpu.memory_space<vmem>>, vector<1x1x4x16xbf16>
    %14 = vector.shape_cast %13 : vector<1x1x4x16xbf16> to vector<4x16xbf16>
    %cst_19 = arith.constant dense<0.000000e+00> : vector<128x16xf32>
    %15 = tpu.matmul %12, %14, %cst_19 {dimension_numbers = #tpu.dot_dimension_numbers<[1], [0], [0], [1], [0, 0, 1, 1], [], []>} : vector<128x4xbf16>, vector<4x16xbf16>, vector<128x16xf32> -> vector<128x16xf32>
    %16 = arith.addf %10, %15 : vector<128x16xf32>
    %c0_20 = arith.constant 0 : index
    %c0_21 = arith.constant 0 : index
    %17 = vector.load %arg4[%c0_20, %c0_21] : memref<128x1xf32, #tpu.memory_space<vmem>>, vector<128x1xf32>
    %18 = vector.broadcast %17 : vector<128x1xf32> to vector<128x16xf32>
    %19 = arith.mulf %16, %18 : vector<128x16xf32>
    %c0_22 = arith.constant 0 : index
    %c0_23 = arith.constant 0 : index
    %20 = vector.load %arg5[%c0_22, %c0_23] : memref<128x1xf32, #tpu.memory_space<vmem>>, vector<128x1xf32>
    %21 = vector.broadcast %20 : vector<128x1xf32> to vector<128x16xf32>
    %22 = arith.addf %19, %21 : vector<128x16xf32>
    %cst_24 = arith.constant 0.000000e+00 : f32
    %23 = vector.broadcast %cst_24 : f32 to vector<128x16xf32>
    %24 = arith.maximumf %22, %23 : vector<128x16xf32>
    %25 = arith.truncf %24 : vector<128x16xf32> to vector<128x16xbf16>
    %c0_25 = arith.constant 0 : index
    %c0_26 = arith.constant 0 : index
    %c0_27 = arith.constant 0 : index
    %26 = vector.load %arg6[%c0_25, %c0_26, %c0_27] : memref<1x128x16xbf16, #tpu.memory_space<vmem>>, vector<1x128x16xbf16>
    %27 = vector.shape_cast %26 : vector<1x128x16xbf16> to vector<128x16xbf16>
    %28 = vector.shape_cast %25 : vector<128x16xbf16> to vector<1x128x16xbf16>
    tpu.vector_store %arg6[%c0_25, %c0_26, %c0_27], %28 {strides = array<i32>} : memref<1x128x16xbf16, #tpu.memory_space<vmem>>, vector<1x128x16xbf16>,
    return
  }
  func.func @transform_0(%arg0: i32, %arg1: i32) -> (i32, i32, i32, i32) {
    %c0_i32 = arith.constant 0 : i32
    %c0_i32_0 = arith.constant 0 : i32
    %c0_i32_1 = arith.constant 0 : i32
    return %c0_i32, %arg0, %c0_i32_0, %arg1 : i32, i32, i32, i32
  }
  func.func @transform_1(%arg0: i32, %arg1: i32) -> (i32, i32, i32) {
    %c0_i32 = arith.constant 0 : i32
    %c0_i32_0 = arith.constant 0 : i32
    %c0_i32_1 = arith.constant 0 : i32
    %c0_i32_2 = arith.constant 0 : i32
    return %c0_i32, %c0_i32_0, %c0_i32_1 : i32, i32, i32
  }
  func.func @transform_2(%arg0: i32, %arg1: i32) -> (i32, i32) {
    %c0_i32 = arith.constant 0 : i32
    %c0_i32_0 = arith.constant 0 : i32
    %c0_i32_1 = arith.constant 0 : i32
    return %c0_i32, %c0_i32_0 : i32, i32
  }
  func.func @transform_3(%arg0: i32, %arg1: i32) -> (i32, i32) {
    %c0_i32 = arith.constant 0 : i32
    %c0_i32_0 = arith.constant 0 : i32
    %c0_i32_1 = arith.constant 0 : i32
    return %c0_i32, %c0_i32_0 : i32, i32
  }
  func.func @transform_4(%arg0: i32, %arg1: i32) -> (i32, i32, i32) {
    %c0_i32 = arith.constant 0 : i32
    %c0_i32_0 = arith.constant 0 : i32
    return %arg0, %c0_i32, %arg1 : i32, i32, i32
  }
}

</mosaic_0001>

<bundles_post_ra>
// kernel: conv_block_forward.1
= control target key start
LH: loop header
LB: loop body
LE: loop exit
PB: predicated region body
PF: predicated region fallthrough
CT: control target
= control target key end

     0   :  { %s1347_s15 = smov 0   ;;  %s1349_s16 = smov 0   ;;  %s1690_s0 = inlined_call_operand.vmem [shape: bf16[3,2,4,16], index: 0, kind: input, shape index: {}]   ;;  %s1691_s1 = inlined_call_operand.vmem [shape: bf16[3,128,4], index: 1, kind: input, shape index: {}]   ;;  %s1692_s2 = inlined_call_operand.vmem [shape: f32[128,1], index: 2, kind: input, shape index: {}]   ;;  %s1693_s3 = inlined_call_operand.vmem [shape: f32[128,1], index: 3, kind: input, shape index: {}]   ;;  %s1694_s4 = inlined_call_operand.vmem [shape: bf16[2,128,16], index: 4, kind: output, shape index: {}]  }
   0x1   :  { %s1351_s17 = smov 0   ;;  %s1353_s18 = smov 0  }
   0x2   :  { %s1355_s19 = smov 0  }
   0x3 LB: > { %s26_s20 = sadd.s32 1, %s1315_s18  ;;  %p42_p1 = scmp.ne.s32.totalorder %s1307_s16, %s1303_s15  ;;  %s1319_s19 = sphi %s1355_s19, %s14_s19   ;;  %s1315_s18 = sphi %s1353_s18, %s1698_s18   ;;  %s1311_s17 = sphi %s1351_s17, %s1697_s17   ;;  %s1307_s16 = sphi %s1349_s16, %s1696_s16   ;;  %s1303_s15 = sphi %s1347_s15, %s1695_s15  }
   0x4   : > { %p28_p0 = scmp.ge.s32.totalorder %s26_s20, 2  ;;  %p43_p2 = scmp.eq.s32.totalorder %s1319_s19, 0 }
   0x5   : > { %s35_s22 = sadd.s32 1, %s1307_s16  ;;  %p1046_p5 = scmp.ge.s32.totalorder %s1319_s19, 2 }
   0x6   : > { %s1700_s20 = smov (%p28_p0, %s26_s20), 0  ;;  %p44_p3 = por %p43_p2, %p42_p1 }
   0x7   : > { %s30_s21 = ssub.s32 %s1315_s18, %s1700_s20  ;;  %168 = sbr.rel (%p1046_p5) target bundleno = 20 (0x14), region = 28 }
   0x8   : > { %p33_p4 = scmp.eq.s32.totalorder %s30_s21, 0 }
   0xa   : > { %s1382_s23 = scalar_select %p33_p4, %s1307_s16, %s35_s22  }
   0xc   : > { %171 = sbr.rel (!%p44_p3) target bundleno = 20 (0x14), region = 32  ;;  %s173_s24 = sand.u32 (%p44_p3), 1, %s1307_s16  }
   0xd   : > { %s1047_s25 = sshll.u32 (%p44_p3), %s1315_s18, 1  ;;  %s1235_s26 = smul.u32 (%p44_p3), 6, %s173_s24 }
   0xe   : > { %s178_s29 = scalar_lea.vmem (%p44_p3), %s1690_s0, %s1047_s25 }
   0xf   : > { %v195_v0 = vld [vmem:[%s178_s29] sm:$0x3] (%p44_p3)  ;;  %v197_v1 = vld [vmem:[%s178_s29 + $0x4] sm:$0x3] (%p44_p3)  ;;  %v199_v2 = vld [vmem:[%s178_s29 + $0x8] sm:$0x3] (%p44_p3) }
  0x10   : > { %s175_s30 = scalar_lea.vmem (%p44_p3), [#allocation2], %s1235_s26 }
  0x11   : > { %196 = vst [vmem:[%s175_s30] sm:$0x3] %v195_v0 }
  0x12   : > { %198 = vst [vmem:[%s175_s30 + $0x2] sm:$0x3] %v197_v1 }
  0x13   : > { %200 = vst [vmem:[%s175_s30 + $0x4] sm:$0x3] %v199_v2 }
  0x14 PF: > { %p1048_p6 = scmp.ge.s32.totalorder %s1319_s19, 1  ;;  %p221_p7 = scmp.lt.s32.totalorder %s1319_s19, 3 }
  0x16   : > { %p222_p8 = pnand %p1048_p6, %p221_p7 }
  0x17   : > { %s228_s11 = sand.u32 (!%p222_p8), 1, %s1303_s15   ;;  %p256_p9 = scmp.lt.s32.totalorder (!%p222_p8), %s1311_s17, 1 }
  0x18   : > { %225 = sbr.rel (%p222_p8) target bundleno = 269 (0x10d), region = 66 }
  0x19   : > { %s1236_s12 = smul.u32 (!%p222_p8), 6, %s228_s11 }
  0x1b   : > { %s230_s13 = scalar_lea.vmem (!%p222_p8), [#allocation2], %s1236_s12 }
  0x1d   : > { %v690_v3 = vld [vmem:[%s1692_s2 + $0x20] sm:$0xff]  ;;  %v688_v4 = vld [vmem:[%s1692_s2 + $0x10] sm:$0xff]  ;;  %v1321_v6 = vmov 0   ;;  %vm366_vm0 = vcmask 1041408   ;;  %vm341_vm1 = vcmask 31744   ;;  %v691_v17 = vld [vmem:[%s1692_s2 + $0x28] sm:$0xff] }
  0x1e   : > { %v686_v5 = vld [vmem:[%s1692_s2] sm:$0xff]  ;;  %1280 = vset.pattern.permute.xlu2 %v1321_v6  ;;  %1279 = vset.pattern.permute.xlu1 %v1321_v6  ;;  %v1222_v14 = vld [vmem:[%s1691_s1 + $0x70] sm:$0xff]  ;;  %v689_v18 = vld [vmem:[%s1692_s2 + $0x18] sm:$0xff]  ;;  %s1702_s17 = smov (!%p256_p9, %s1311_s17), 1  ;;  %vm942_vm2 = vcmask 125952  }
  0x1f   : > { %1278 = vset.pattern.permute.xlu0 %v1321_v6  ;;  %724 = vperm.xlu2 %1280, %v690_v3   ;;  %v1067_v7 = vld [vmem:[%s230_s13 + $0x2] sm:$0x3]  ;;  %v281_v8 = vld [vmem:[%s230_s13] sm:$0x3]  ;;  %v1164_v9 = vld [vmem:[%s230_s13 + $0x4] sm:$0x3] }
  0x20   : > { %714 = vperm.xlu1 %1279, %v688_v4   ;;  %704 = vperm.xlu0 %1278, %v686_v5   ;;  %v368_v10 = vsel %vm366_vm0, %v1067_v7, 0  ;;  %v484_v11 = vsel %vm366_vm0, %v281_v8, 0  ;;  %v619_v12 = vsel %vm366_vm0, %v1164_v9, 0  ;;  %v1216_v13 = vld [vmem:[%s1691_s1 + $0x40] sm:$0xff]  ;;  %v687_v19 = vld [vmem:[%s1692_s2 + $0x8] sm:$0xff]  ;;  %v693_v21 = vld [vmem:[%s1692_s2 + $0x38] sm:$0xff] }
  0x21   : > { %377 = vmatpush.bf16.msra.mxu0 %v368_v10  ;;  %1232 = vmatpush.bf16.msra.mxu3 %v368_v10  ;;  %v1208_v15 = vld [vmem:[%s1691_s1] sm:$0xff]  ;;  %v692_v22 = vld [vmem:[%s1692_s2 + $0x30] sm:$0xff]  ;;  %v1217_v23 = vld [vmem:[%s1691_s1 + $0x48] sm:$0xff]  ;;  %s1207_s26 = sshll.u32 %s1702_s17, 6 }
  0x22   : > { %v1224_v16 = vld [vmem:[%s1691_s1 + $0x80] sm:$0xff]  ;;  %493 = vmatpush.bf16.msra.mxu1 %v484_v11  ;;  %628 = vmatpush.bf16.msra.mxu2 %v619_v12  ;;  %v1223_v24 = vld [vmem:[%s1691_s1 + $0x78] sm:$0xff]  ;;  %v1209_v25 = vld [vmem:[%s1691_s1 + $0x8] sm:$0xff]  ;;  %s1618_s29 = scalar_lea.vmem %s1694_s4, %s1207_s26 }
  0x23   : > { %v694_v20 = vld [vmem:[%s1692_s2 + $0x40] sm:$0xff]  ;;  %v1225_v26 = vld [vmem:[%s1691_s1 + $0x88] sm:$0xff]  ;;  %v697_v27 = vld [vmem:[%s1692_s2 + $0x58] sm:$0xff] }
  0x24   : > { %1100 = vmatmul.msk.bf16.vlgmr.msra.gmra.mxu0 %vm341_vm1, %v1216_v13  ;;  %1106 = vmatmul.msk.bf16.vlgmr.msra.gmra.mxu3 %vm341_vm1, %v1222_v14  ;;  %v696_v28 = vld [vmem:[%s1692_s2 + $0x50] sm:$0xff]  ;;  %v695_v29 = vld [vmem:[%s1692_s2 + $0x48] sm:$0xff]  ;;  %v698_v32 = vld [vmem:[%s1692_s2 + $0x60] sm:$0xff] }
  0x25   : > { %1233 = vmatpush.bf16.msrb.mxu3 %v484_v11  ;;  %1140 = vmatmul.msk.bf16.vlgmr.msra.gmra.mxu1 %vm341_vm1, %v1208_v15  ;;  %v700_v30 = vld [vmem:[%s1692_s2 + $0x70] sm:$0xff]  ;;  %v699_v31 = vld [vmem:[%s1692_s2 + $0x68] sm:$0xff]  ;;  %v798_v38 = vld [vmem:[%s1693_s3] sm:$0xff] }
  0x26   : > { %1197 = vmatmul.msk.bf16.vlgmr.msra.gmra.mxu2 %vm341_vm1, %v1224_v16  ;;  %v1218_v33 = vld [vmem:[%s1691_s1 + $0x50] sm:$0xff]  ;;  %v799_v37 = vld [vmem:[%s1693_s3 + $0x8] sm:$0xff]  ;;  %v701_v39 = vld [vmem:[%s1692_s2 + $0x78] sm:$0xff] }
  0x27   : > { %729 = vperm.xlu2 %1280, %v691_v17   ;;  %v1214_v34 = vld [vmem:[%s1691_s1 + $0x30] sm:$0xff]  ;;  %v802_v40 = vld [vmem:[%s1693_s3 + $0x20] sm:$0xff]  ;;  %v801_v41 = vld [vmem:[%s1693_s3 + $0x18] sm:$0xff] }
  0x28   : > { %719 = vperm.xlu1 %1279, %v689_v18   ;;  %709 = vperm.xlu0 %1278, %v687_v19   ;;  %v1210_v35 = vld [vmem:[%s1691_s1 + $0x10] sm:$0xff]  ;;  %v1219_v43 = vld [vmem:[%s1691_s1 + $0x58] sm:$0xff]  ;;  %v803_v49 = vld [vmem:[%s1693_s3 + $0x28] sm:$0xff] }
  0x29   : > { %1234 = vmatpush.bf16.msra.mxu3 %v619_v12  ;;  %v1226_v36 = vld [vmem:[%s1691_s1 + $0x90] sm:$0xff]  ;;  %v1215_v44 = vld [vmem:[%s1691_s1 + $0x38] sm:$0xff]  ;;  %v807_v51 = vld [vmem:[%s1693_s3 + $0x48] sm:$0xff] }
  0x2a   : > { %v800_v42 = vld [vmem:[%s1693_s3 + $0x10] sm:$0xff]  ;;  %v1211_v45 = vld [vmem:[%s1691_s1 + $0x18] sm:$0xff]  ;;  %v806_v52 = vld [vmem:[%s1693_s3 + $0x40] sm:$0xff] }
  0x2b   : > { %v1227_v46 = vld [vmem:[%s1691_s1 + $0x98] sm:$0xff]  ;;  %v804_v48 = vld [vmem:[%s1693_s3 + $0x30] sm:$0xff]  ;;  %v1220_v53 = vld [vmem:[%s1691_s1 + $0x60] sm:$0xff] }
  0x2c   : > { %v805_v47 = vld [vmem:[%s1693_s3 + $0x38] sm:$0xff]  ;;  %v808_v50 = vld [vmem:[%s1693_s3 + $0x50] sm:$0xff]  ;;  %v1212_v55 = vld [vmem:[%s1691_s1 + $0x20] sm:$0xff] }
  0x2d   : > { %v1230_v54 = vld [vmem:[%s1691_s1 + $0xb0] sm:$0xff]  ;;  %v1228_v56 = vld [vmem:[%s1691_s1 + $0xa0] sm:$0xff]  ;;  %v811_v57 = vld [vmem:[%s1693_s3 + $0x68] sm:$0xff] }
  0x2e   : > { %v810_v58 = vld [vmem:[%s1693_s3 + $0x60] sm:$0xff]  ;;  %v809_v59 = vld [vmem:[%s1693_s3 + $0x58] sm:$0xff]  ;;  %v812_v61 = vld [vmem:[%s1693_s3 + $0x70] sm:$0xff] }
  0x2f   : > { %744 = vperm.xlu2 %1280, %v694_v20   ;;  %v813_v60 = vld [vmem:[%s1693_s3 + $0x78] sm:$0xff]  ;;  %v1221_v62 = vld [vmem:[%s1691_s1 + $0x68] sm:$0xff] }
  0x30   : > { %739 = vperm.xlu1 %1279, %v693_v21   ;;  %734 = vperm.xlu0 %1278, %v692_v22   ;;  %v1231_v63 = vld [vmem:[%s1691_s1 + $0xb8] sm:$0xff]  ;;  %v1213_v0 = vld [vmem:[%s1691_s1 + $0x28] sm:$0xff] }
  0x31   : > { %v1229_v1 = vld [vmem:[%s1691_s1 + $0xa8] sm:$0xff] }
  0x34   : > { %1101 = vmatmul.msk.bf16.gmra.mxu0 %vm341_vm1, %v1217_v23  ;;  %1107 = vmatmul.msk.bf16.gmra.mxu3 %vm341_vm1, %v1223_v24 }
  0x35   : > { %1141 = vmatmul.msk.bf16.gmra.mxu1 %vm341_vm1, %v1209_v25 }
  0x36   : > { %1198 = vmatmul.msk.bf16.gmra.mxu2 %vm341_vm1, %v1225_v26 }
  0x37   : > { %759 = vperm.xlu2 %1280, %v697_v27  }
  0x38   : > { %754 = vperm.xlu1 %1279, %v696_v28   ;;  %749 = vperm.xlu0 %1278, %v695_v29  }
  0x3f   : > { %774 = vperm.xlu2 %1280, %v700_v30  }
  0x40   : > { %769 = vperm.xlu1 %1279, %v699_v31   ;;  %764 = vperm.xlu0 %1278, %v698_v32  }
  0x44   : > { %1102 = vmatmul.msk.bf16.gmra.mxu0 %vm341_vm1, %v1218_v33  ;;  %1146 = vmatmul.msk.bf16.vlgmr.msrb.gmra.mxu3 %vm341_vm1, %v1214_v34 }
  0x45   : > { %1142 = vmatmul.msk.bf16.gmra.mxu1 %vm341_vm1, %v1210_v35 }
  0x46   : > { %1199 = vmatmul.msk.bf16.gmra.mxu2 %vm341_vm1, %v1226_v36 }
  0x47   : > { %821 = vperm.xlu2 %1280, %v799_v37  }
  0x48   : > { %816 = vperm.xlu1 %1279, %v798_v38   ;;  %779 = vperm.xlu0 %1278, %v701_v39  }
  0x4f   : > { %836 = vperm.xlu2 %1280, %v802_v40  }
  0x50   : > { %831 = vperm.xlu1 %1279, %v801_v41   ;;  %826 = vperm.xlu0 %1278, %v800_v42  }
  0x54   : > { %1103 = vmatmul.msk.bf16.gmra.mxu0 %vm341_vm1, %v1219_v43  ;;  %1147 = vmatmul.msk.bf16.gmra.mxu3 %vm341_vm1, %v1215_v44 }
  0x55   : > { %1143 = vmatmul.msk.bf16.gmra.mxu1 %vm341_vm1, %v1211_v45 }
  0x56   : > { %1200 = vmatmul.msk.bf16.gmra.mxu2 %vm341_vm1, %v1227_v46 }
  0x57   : > { %851 = vperm.xlu2 %1280, %v805_v47  }
  0x58   : > { %846 = vperm.xlu1 %1279, %v804_v48   ;;  %841 = vperm.xlu0 %1278, %v803_v49  }
  0x5f   : > { %866 = vperm.xlu2 %1280, %v808_v50  }
  0x60   : > { %861 = vperm.xlu1 %1279, %v807_v51   ;;  %856 = vperm.xlu0 %1278, %v806_v52  }
  0x64   : > { %1104 = vmatmul.msk.bf16.gmra.mxu0 %vm341_vm1, %v1220_v53  ;;  %1203 = vmatmul.msk.bf16.vlgmr.msra.gmra.mxu3 %vm341_vm1, %v1230_v54 }
  0x65   : > { %1144 = vmatmul.msk.bf16.gmra.mxu1 %vm341_vm1, %v1212_v55 }
  0x66   : > { %1201 = vmatmul.msk.bf16.gmra.mxu2 %vm341_vm1, %v1228_v56 }
  0x67   : > { %881 = vperm.xlu2 %1280, %v811_v57  }
  0x68   : > { %876 = vperm.xlu1 %1279, %v810_v58   ;;  %871 = vperm.xlu0 %1278, %v809_v59  }
  0x70   : > { %891 = vperm.xlu1 %1279, %v813_v60   ;;  %886 = vperm.xlu0 %1278, %v812_v61  }
  0x74   : > { %1105 = vmatmul.msk.bf16.gmra.mxu0 %vm341_vm1, %v1221_v62  ;;  %1204 = vmatmul.msk.bf16.gmra.mxu3 %vm341_vm1, %v1231_v63 }
  0x75   : > { %1145 = vmatmul.msk.bf16.gmra.mxu1 %vm341_vm1, %v1213_v0 }
  0x76   : > { %1202 = vmatmul.msk.bf16.gmra.mxu2 %vm341_vm1, %v1229_v1 }
  0x79   : > { %v1585_v2 = vpop.permute.xlu2 %724 }
  0x81   : > { %v1587_v3 = vpop.permute.xlu2 %729 }
  0x89   : > { %v1589_v6 = vpop.permute.xlu2 %744 }
  0x91   : > { %v1591_v9 = vpop.permute.xlu2 %759 }
  0x92   : > { %v715_v4 = vpop.permute.xlu1 %714  ;;  %v705_v5 = vpop.permute.xlu0 %704 }
  0x99   : > { %v1603_v20 = vpop.permute.xlu2 %774 }
  0x9a   : > { %v720_v7 = vpop.permute.xlu1 %719  ;;  %v710_v8 = vpop.permute.xlu0 %709 }
  0xa1   : > { %v379_v12 = vpop.f32.mrf.mxu0  ;;  %v822_v32 = vpop.permute.xlu2 %821 }
  0xa2   : > { %v1593_v10 = vpop.permute.xlu1 %739  ;;  %v1595_v11 = vpop.permute.xlu0 %734 }
  0xa3   : > { %v495_v13 = vpop.f32.mrf.mxu1 }
  0xa4   : > { %v496_v21 = vadd.f32 %v495_v13, %v379_v12 }
  0xa7   : > { %v1597_v14 = vpop.f32.mrf.mxu3 }
  0xa9   : > { %v630_v17 = vpop.f32.mrf.mxu2  ;;  %v381_v18 = vpop.f32.mrf.mxu0 }
  0xaa   : > { %v1599_v15 = vpop.permute.xlu1 %754  ;;  %v1601_v16 = vpop.permute.xlu0 %749  ;;  %v670_v30 = vadd.f32 %v630_v17, %v496_v21 }
  0xab   : > { %v497_v19 = vpop.f32.mrf.mxu1  ;;  %v837_v17 = vpop.permute.xlu2 %836 }
  0xac   : > { %v498_v23 = vadd.f32 %v497_v19, %v381_v18  ;;  %v782_v34 = vmul.f32 %v705_v5, %v670_v30 }
  0xaf   : > { %v1606_v22 = vpop.f32.mrf.mxu3 }
  0xb1   : > { %v632_v26 = vpop.f32.mrf.mxu2  ;;  %v384_v28 = vpop.f32.mrf.mxu0 }
  0xb2   : > { %v1608_v24 = vpop.permute.xlu1 %769  ;;  %v1610_v25 = vpop.permute.xlu0 %764  ;;  %v671_v27 = vadd.f32 %v632_v26, %v498_v23 }
  0xb3   : > { %v500_v29 = vpop.f32.mrf.mxu1 }
  0xb4   : > { %v783_v31 = vmul.f32 %v710_v8, %v671_v27  ;;  %v501_v37 = vadd.f32 %v500_v29, %v384_v28 }
  0xb6   : > { %v895_v33 = vadd.f32 %v822_v32, %v783_v31 }
  0xb7   : > { %v1613_v35 = vpop.f32.mrf.mxu3 }
  0xb8   : > { %v911_v36 = vmax.f32 %v895_v33, 0.0 }
  0xb9   : > { %v635_v41 = vpop.f32.mrf.mxu2  ;;  %v386_v43 = vpop.f32.mrf.mxu0 }
  0xba   : > { %v817_v38 = vpop.permute.xlu1 %816  ;;  %v1620_v40 = vpop.permute.xlu0 %779  ;;  %v927_v42 = vpack.c.bf16 %v911_v36, %v911_v36  ;;  %v672_v46 = vadd.f32 %v635_v41, %v501_v37 }
  0xbb   : > { %v894_v39 = vadd.f32 %v817_v38, %v782_v34  ;;  %v502_v44 = vpop.f32.mrf.mxu1 }
  0xbc   : > { %944 = vst.msk [vmem:[%s1618_s29 + $0x4] sm:$0xf] %vm942_vm2, %v927_v42  ;;  %v503_v49 = vadd.f32 %v502_v44, %v386_v43  ;;  %v784_v50 = vmul.f32 %v715_v4, %v672_v46  ;;  %v852_v44 = vpop.permute.xlu2 %851 }
  0xbd   : > { %v910_v45 = vmax.f32 %v894_v39, 0.0 }
  0xbf   : > { %v926_v47 = vpack.c.bf16 %v910_v45, %v910_v45  ;;  %v1626_v48 = vpop.f32.mrf.mxu3 }
  0xc1   : > { %943 = vst.msk [vmem:[%s1618_s29] sm:$0xf] %vm942_vm2, %v926_v47  ;;  %v637_v52 = vpop.f32.mrf.mxu2  ;;  %v389_v55 = vpop.f32.mrf.mxu0 }
  0xc2   : > { %v827_v51 = vpop.permute.xlu0 %826  ;;  %v673_v54 = vadd.f32 %v637_v52, %v503_v49  ;;  %v832_v59 = vpop.permute.xlu1 %831 }
  0xc3   : > { %v896_v53 = vadd.f32 %v827_v51, %v784_v50  ;;  %v505_v56 = vpop.f32.mrf.mxu1 }
  0xc4   : > { %v785_v58 = vmul.f32 %v720_v7, %v673_v54  ;;  %v506_v62 = vadd.f32 %v505_v56, %v389_v55 }
  0xc5   : > { %v912_v57 = vmax.f32 %v896_v53, 0.0 }
  0xc6   : > { %v897_v61 = vadd.f32 %v832_v59, %v785_v58 }
  0xc7   : > { %v928_v60 = vpack.c.bf16 %v912_v57, %v912_v57  ;;  %v525_v63 = vpop.f32.mrf.mxu3 }
  0xc8   : > { %v913_v0 = vmax.f32 %v897_v61, 0.0  ;;  %v526_v56 = vadd.f32 %v525_v63, %v1597_v14 }
  0xc9   : > { %945 = vst.msk [vmem:[%s1618_s29 + $0x8] sm:$0xf] %vm942_vm2, %v928_v60  ;;  %v640_v1 = vpop.f32.mrf.mxu2  ;;  %v391_v8 = vpop.f32.mrf.mxu0 }
  0xca   : > { %v929_v5 = vpack.c.bf16 %v913_v0, %v913_v0  ;;  %v674_v4 = vadd.f32 %v640_v1, %v506_v62  ;;  %v842_v31 = vpop.permute.xlu0 %841  ;;  %v847_v34 = vpop.permute.xlu1 %846 }
  0xcb   : > { %v507_v12 = vpop.f32.mrf.mxu1  ;;  %v867_v60 = vpop.permute.xlu2 %866 }
  0xcc   : > { %946 = vst.msk [vmem:[%s1618_s29 + $0xc] sm:$0xf] %vm942_vm2, %v929_v5  ;;  %v786_v13 = vmul.f32 %v1585_v2, %v674_v4  ;;  %v508_v21 = vadd.f32 %v507_v12, %v391_v8 }
  0xce   : > { %v898_v7 = vadd.f32 %v837_v17, %v786_v13 }
  0xcf   : > { %v527_v18 = vpop.f32.mrf.mxu3 }
  0xd0   : > { %v914_v19 = vmax.f32 %v898_v7, 0.0  ;;  %v528_v63 = vadd.f32 %v527_v18, %v1606_v22 }
  0xd1   : > { %v642_v23 = vpop.f32.mrf.mxu2  ;;  %v394_v28 = vpop.f32.mrf.mxu0 }
  0xd2   : > { %v930_v26 = vpack.c.bf16 %v914_v19, %v914_v19  ;;  %v675_v27 = vadd.f32 %v642_v23, %v508_v21  ;;  %v862_v49 = vpop.permute.xlu1 %861  ;;  %v857_v58 = vpop.permute.xlu0 %856 }
  0xd3   : > { %v510_v29 = vpop.f32.mrf.mxu1 }
  0xd4   : > { %947 = vst.msk [vmem:[%s1618_s29 + $0x10] sm:$0xf] %vm942_vm2, %v930_v26  ;;  %v787_v30 = vmul.f32 %v1587_v3, %v675_v27  ;;  %v511_v33 = vadd.f32 %v510_v29, %v394_v28  ;;  %v882_v29 = vpop.permute.xlu2 %881 }
  0xd6   : > { %v899_v32 = vadd.f32 %v842_v31, %v787_v30 }
  0xd7   : > { %v530_v2 = vpop.f32.mrf.mxu3 }
  0xd8   : > { %v915_v36 = vmax.f32 %v899_v32, 0.0 }
  0xd9   : > { %v645_v37 = vpop.f32.mrf.mxu2  ;;  %v396_v41 = vpop.f32.mrf.mxu0 }
  0xda   : > { %v931_v38 = vpack.c.bf16 %v915_v36, %v915_v36  ;;  %v676_v39 = vadd.f32 %v645_v37, %v511_v33  ;;  %v877_v13 = vpop.permute.xlu1 %876 }
  0xdb   : > { %v512_v42 = vpop.f32.mrf.mxu1 }
  0xdc   : > { %948 = vst.msk [vmem:[%s1618_s29 + $0x14] sm:$0xf] %vm942_vm2, %v931_v38  ;;  %v788_v43 = vmul.f32 %v1595_v11, %v676_v39  ;;  %v513_v47 = vadd.f32 %v512_v42, %v396_v41 }
  0xde   : > { %v900_v45 = vadd.f32 %v847_v34, %v788_v43  ;;  %v531_v34 = vadd.f32 %v530_v2, %v1613_v35 }
  0xdf   : > { %v1639_v46 = vpop.f32.mrf.mxu3 }
  0xe0   : > { %v916_v3 = vmax.f32 %v900_v45, 0.0 }
  0xe1   : > { %v647_v50 = vpop.f32.mrf.mxu2  ;;  %v399_v53 = vpop.f32.mrf.mxu0 }
  0xe2   : > { %v932_v51 = vpack.c.bf16 %v916_v3, %v916_v3  ;;  %v677_v52 = vadd.f32 %v647_v50, %v513_v47  ;;  %v533_v50 = vadd.f32 %v1639_v46, %v1626_v48 }
  0xe3   : > { %v515_v54 = vpop.f32.mrf.mxu1 }
  0xe4   : > { %949 = vst.msk [vmem:[%s1618_s29 + $0x18] sm:$0xf] %vm942_vm2, %v932_v51  ;;  %v789_v55 = vmul.f32 %v1593_v10, %v677_v52  ;;  %v516_v57 = vadd.f32 %v515_v54, %v399_v53 }
  0xe6   : > { %v901_v11 = vadd.f32 %v852_v44, %v789_v55 }
  0xe7   : > { %v660_v59 = vpop.f32.mrf.mxu3 }
  0xe8   : > { %v917_v61 = vmax.f32 %v901_v11, 0.0  ;;  %v682_v62 = vadd.f32 %v660_v59, %v526_v56  ;;  %v892_v59 = vpop.permute.xlu1 %891 }
  0xe9   : > { %v650_v0 = vpop.f32.mrf.mxu2  ;;  %v401_v8 = vpop.f32.mrf.mxu0 }
  0xea   : > { %v933_v1 = vpack.c.bf16 %v917_v61, %v917_v61  ;;  %v678_v5 = vadd.f32 %v650_v0, %v516_v57  ;;  %v794_v4 = vmul.f32 %v1610_v25, %v682_v62  ;;  %v872_v25 = vpop.permute.xlu0 %871 }
  0xeb   : > { %v517_v12 = vpop.f32.mrf.mxu1 }
  0xec   : > { %950 = vst.msk [vmem:[%s1618_s29 + $0x1c] sm:$0xf] %vm942_vm2, %v933_v1  ;;  %v790_v10 = vmul.f32 %v1589_v6, %v678_v5  ;;  %v906_v14 = vadd.f32 %v877_v13, %v794_v4  ;;  %v518_v26 = vadd.f32 %v517_v12, %v401_v8 }
  0xee   : > { %v902_v17 = vadd.f32 %v857_v58, %v790_v10  ;;  %v922_v7 = vmax.f32 %v906_v14, 0.0 }
  0xef   : > { %v662_v19 = vpop.f32.mrf.mxu3 }
  0xf0   : > { %v918_v21 = vmax.f32 %v902_v17, 0.0  ;;  %v938_v23 = vpack.c.bf16 %v922_v7, %v922_v7  ;;  %v683_v27 = vadd.f32 %v662_v19, %v528_v63 }
  0xf1   : > { %v652_v28 = vpop.f32.mrf.mxu2  ;;  %v404_v32 = vpop.f32.mrf.mxu0 }
  0xf2   : > { %v934_v30 = vpack.c.bf16 %v918_v21, %v918_v21  ;;  %955 = vst.msk [vmem:[%s1618_s29 + $0x30] sm:$0xf] %vm942_vm2, %v938_v23  ;;  %v679_v31 = vadd.f32 %v652_v28, %v518_v26  ;;  %v795_v6 = vmul.f32 %v1608_v24, %v683_v27  ;;  %v887_v47 = vpop.permute.xlu0 %886 }
  0xf3   : > { %v520_v22 = vpop.f32.mrf.mxu1 }
  0xf4   : > { %951 = vst.msk [vmem:[%s1618_s29 + $0x20] sm:$0xf] %vm942_vm2, %v934_v30  ;;  %v791_v18 = vmul.f32 %v1601_v16, %v679_v31  ;;  %v907_v33 = vadd.f32 %v882_v29, %v795_v6  ;;  %v521_v38 = vadd.f32 %v520_v22, %v404_v32 }
  0xf6   : > { %v903_v36 = vadd.f32 %v862_v49, %v791_v18  ;;  %v923_v37 = vmax.f32 %v907_v33, 0.0 }
  0xf7   : > { %v665_v39 = vpop.f32.mrf.mxu3 }
  0xf8   : > { %v919_v41 = vmax.f32 %v903_v36, 0.0  ;;  %v939_v42 = vpack.c.bf16 %v923_v37, %v923_v37  ;;  %v684_v43 = vadd.f32 %v665_v39, %v531_v34 }
  0xf9   : > { %v655_v44 = vpop.f32.mrf.mxu2  ;;  %v406_v2 = vpop.f32.mrf.mxu0 }
  0xfa   : > { %v935_v24 = vpack.c.bf16 %v919_v41, %v919_v41  ;;  %956 = vst.msk [vmem:[%s1618_s29 + $0x34] sm:$0xf] %vm942_vm2, %v939_v42  ;;  %v680_v45 = vadd.f32 %v655_v44, %v521_v38  ;;  %v796_v3 = vmul.f32 %v1603_v20, %v684_v43 }
  0xfb   : > { %v522_v49 = vpop.f32.mrf.mxu1 }
  0xfc   : > { %952 = vst.msk [vmem:[%s1618_s29 + $0x24] sm:$0xf] %vm942_vm2, %v935_v24  ;;  %v792_v16 = vmul.f32 %v1599_v15, %v680_v45  ;;  %v908_v35 = vadd.f32 %v887_v47, %v796_v3  ;;  %v523_v56 = vadd.f32 %v522_v49, %v406_v2 }
  0xfe   : > { %v904_v51 = vadd.f32 %v867_v60, %v792_v16  ;;  %v924_v52 = vmax.f32 %v908_v35, 0.0 }
  0xff   : > { %v667_v53 = vpop.f32.mrf.mxu3 }
 0x100   : > { %v920_v54 = vmax.f32 %v904_v51, 0.0  ;;  %v940_v55 = vpack.c.bf16 %v924_v52, %v924_v52  ;;  %v685_v20 = vadd.f32 %v667_v53, %v533_v50 }
 0x101   : > { %v657_v11 = vpop.f32.mrf.mxu2 }
 0x102   : > { %v936_v57 = vpack.c.bf16 %v920_v54, %v920_v54  ;;  %957 = vst.msk [vmem:[%s1618_s29 + $0x38] sm:$0xf] %vm942_vm2, %v940_v55  ;;  %v681_v15 = vadd.f32 %v657_v11, %v523_v56  ;;  %v797_v58 = vmul.f32 %v1620_v40, %v685_v20 }
 0x104   : > { %953 = vst.msk [vmem:[%s1618_s29 + $0x28] sm:$0xf] %vm942_vm2, %v936_v57  ;;  %v793_v48 = vmul.f32 %v1591_v9, %v681_v15  ;;  %v909_v46 = vadd.f32 %v892_v59, %v797_v58 }
 0x106   : > { %v905_v60 = vadd.f32 %v872_v25, %v793_v48  ;;  %v925_v61 = vmax.f32 %v909_v46, 0.0 }
 0x108   : > { %v921_v62 = vmax.f32 %v905_v60, 0.0  ;;  %v941_v0 = vpack.c.bf16 %v925_v61, %v925_v61 }
 0x10a   : > { %v937_v1 = vpack.c.bf16 %v921_v62, %v921_v62  ;;  %958 = vst.msk [vmem:[%s1618_s29 + $0x3c] sm:$0xf] %vm942_vm2, %v941_v0 }
 0x10c   : > { %954 = vst.msk [vmem:[%s1618_s29 + $0x2c] sm:$0xf] %vm942_vm2, %v937_v1 }
 0x10d PF: > { %s14_s19 = sadd.s32 1, %s1319_s19   ;;  %s1695_s15 = smov %s1307_s16 }
 0x10e   : > { %p11_p10 = scmp.ge.s32.totalorder %s14_s19, 4   ;;  %s1696_s16 = smov %s1382_s23 }
 0x10f   : > { %s1697_s17 = smov %s1315_s18  ;;  %s1698_s18 = smov %s1700_s20 }
 0x110   :  { %13 = sbr.rel (!%p11_p10) target bundleno = 3 (0x3), region = 109 }

</bundles_post_ra>
